<compile_context>
chip_gen: v7x
topology: tpu7x:2x2x1
jax: 0.10.0
libtpu: 0.0.40
codegen_flags: <defaults>
</compile_context>

<pallas_src>
import functools

import jax
import jax.numpy as jnp
from jax.experimental import pallas as pl
from jax.experimental.pallas import tpu as pltpu

LANES = 128
SUBLANES = 8


def _round_up(x, m):
    return ((x + m - 1) // m) * m


def _tpu_config():
    """Per-generation sharding / tiling / VMEM knobs."""
    kind = ""
    try:
        kind = jax.devices()[0].device_kind.lower()
    except Exception:
        pass
    if "v7" in kind:
        # 2 TensorCores per chip, 64 MiB physical VMEM: re-derived (smaller)
        # tile + real 2-TC split of the row range.
        return dict(num_shards=2, max_tile_rows=4096, vmem_cap=40 << 20)
    if "v6" in kind:
        # Single TC, 128 MiB VMEM, fast HBM: big tiles amortize ~0.35us/step.
        return dict(num_shards=1, max_tile_rows=8192, vmem_cap=64 << 20)
    # v5e / unknown: single TC, conservative tile.
    return dict(num_shards=1, max_tile_rows=4096, vmem_cap=48 << 20)


def _norm_kernel(p_ref, t_ref, num_ref, den_ref, num_acc, den_acc, *,
                 rows, tile_rows, steps_per_shard, num_shards, any_mask):
    if num_shards > 1:
        c = pl.program_id(0)        # shard (TensorCore) index
        i = pl.program_id(1)        # reduction step within the shard
    else:
        c = 0
        i = pl.program_id(0)

    # Small resident accumulators: init once per shard.
    @pl.when(i == 0)
    def _():
        num_acc[...] = jnp.zeros_like(num_acc)
        den_acc[...] = jnp.zeros_like(den_acc)

    # Cast on load: native-dtype HBM traffic, widening is free on the VPU.
    p = p_ref[...].astype(jnp.float32)
    t = t_ref[...].astype(jnp.float32)

    groups = tile_rows // SUBLANES

    def accumulate(pv, tv):
        d = pv - tv
        nsq = d * d
        dsq = tv * tv
        # Fold (tile_rows, 128) -> (8, 128): the reshape matches the physical
        # (sublane, lane) layout, so this is pure vreg-aligned VALU adds
        # (no XLU reduce, no full-tile read-modify-write).
        num_acc[...] += nsq.reshape(groups, SUBLANES, LANES).sum(axis=0)
        den_acc[...] += dsq.reshape(groups, SUBLANES, LANES).sum(axis=0)

    if any_mask:
        # Only partial / clamped-duplicate blocks pay for iota + selects.
        row0 = (c * steps_per_shard + i) * tile_rows
        is_full = row0 + tile_rows <= rows

        @pl.when(is_full)
        def _():
            accumulate(p, t)

        @pl.when(jnp.logical_not(is_full))
        def _():
            row_idx = row0 + jax.lax.broadcasted_iota(
                jnp.int32, (tile_rows, LANES), 0)
            valid = row_idx < rows
            # Mask *before* the subtraction so OOB garbage never propagates.
            accumulate(jnp.where(valid, p, 0.0), jnp.where(valid, t, 0.0))
    else:
        accumulate(p, t)

    # Write the tiny (8,128) accumulators out once per shard.
    @pl.when(i == steps_per_shard - 1)
    def _():
        num_ref[...] = num_acc[...]
        den_ref[...] = den_acc[...]


def _sum_squares(y_pred, y_true, *, max_tile_rows=None):
    """Returns (sum((pred-true)^2), sum(true^2)) as f32 scalars."""
    cfg = _tpu_config()
    if max_tile_rows is None:
        max_tile_rows = cfg["max_tile_rows"]

    pf = jnp.ravel(y_pred)          # metadata-only reshape, keep native dtype
    tf = jnp.ravel(y_true)
    n = pf.shape[0]

    rows = n // LANES
    bulk = rows * LANES

    # Ragged tail (< 128 elements): tiny jnp epilogue instead of padding /
    # rewriting both full inputs in HBM.
    tail_num = jnp.float32(0.0)
    tail_den = jnp.float32(0.0)
    if bulk != n:
        pt = pf[bulk:].astype(jnp.float32)
        tt = tf[bulk:].astype(jnp.float32)
        dt = pt - tt
        tail_num = jnp.sum(dt * dt)
        tail_den = jnp.sum(tt * tt)

    if rows == 0:
        return tail_num, tail_den

    if bulk == n:                    # pure metadata reshape (no copy)
        p2 = pf.reshape(rows, LANES)
        t2 = tf.reshape(rows, LANES)
    else:
        # TODO(synk): ragged bulk still goes through a prefix slice that XLA
        # may materialize as a copy; a fully copy-free path needs 1-D blocks
        # plus an in-kernel reshape, which is riskier to lower.
        p2 = pf[:bulk].reshape(rows, LANES)
        t2 = tf[:bulk].reshape(rows, LANES)

    # Sublane packing per dtype: f32 -> 8, bf16/f16 -> 16, int8/fp8 -> 32.
    itemsize = pf.dtype.itemsize
    packing = SUBLANES * max(1, 4 // max(1, itemsize))

    num_shards = cfg["num_shards"]
    tile_rows = min(max_tile_rows, _round_up(rows, packing))
    tile_rows = max(tile_rows, packing)
    nblocks = pl.cdiv(rows, tile_rows)
    if nblocks < num_shards:
        num_shards = 1               # don't shard fewer blocks than cores
    steps_per_shard = pl.cdiv(nblocks, num_shards)
    any_mask = (rows % tile_rows != 0) or (
        nblocks != num_shards * steps_per_shard)

    if num_shards > 1:
        grid = (num_shards, steps_per_shard)

        def in_map(c, i):
            # Clamp padded steps to a valid block (fully masked in-kernel)
            # instead of issuing an out-of-range DMA.
            return (jnp.minimum(c * steps_per_shard + i, nblocks - 1), 0)

        def out_map(c, i):
            return (c, 0)

        dims = (getattr(pltpu, "CORE_PARALLEL", "parallel"),
                getattr(pltpu, "ARBITRARY", "arbitrary"))
    else:
        grid = (steps_per_shard,)

        def in_map(i):
            return (i, 0)

        def out_map(i):
            return (0, 0)

        dims = ("arbitrary",)

    # Optional 3-deep input buffering for long reductions (sweepable).
    in_spec_kwargs = {}
    nbuf = 2
    if steps_per_shard >= 4 and hasattr(pl, "Buffered"):
        in_spec_kwargs["pipeline_mode"] = pl.Buffered(3)
        nbuf = 3
    in_spec = pl.BlockSpec((tile_rows, LANES), in_map, **in_spec_kwargs)

    tile_bytes = tile_rows * LANES * itemsize
    vmem_limit = min(cfg["vmem_cap"],
                     max(2 * nbuf * tile_bytes + (8 << 20), 16 << 20))

    kernel = functools.partial(
        _norm_kernel,
        rows=rows,
        tile_rows=tile_rows,
        steps_per_shard=steps_per_shard,
        num_shards=num_shards,
        any_mask=any_mask,
    )

    cost = pl.CostEstimate(
        flops=7 * bulk, transcendentals=0,
        bytes_accessed=2 * bulk * itemsize
        + 2 * num_shards * SUBLANES * LANES * 4)

    num_part, den_part = pl.pallas_call(
        kernel,
        out_shape=(
            jax.ShapeDtypeStruct((num_shards * SUBLANES, LANES), jnp.float32),
            jax.ShapeDtypeStruct((num_shards * SUBLANES, LANES), jnp.float32),
        ),
        grid_spec=pltpu.PrefetchScalarGridSpec(
            num_scalar_prefetch=0,
            grid=grid,
            in_specs=[in_spec, in_spec],
            out_specs=[
                pl.BlockSpec((SUBLANES, LANES), out_map),
                pl.BlockSpec((SUBLANES, LANES), out_map),
            ],
            scratch_shapes=[
                pltpu.VMEM((SUBLANES, LANES), jnp.float32),
                pltpu.VMEM((SUBLANES, LANES), jnp.float32),
            ],
        ),
        compiler_params=pltpu.CompilerParams(
            dimension_semantics=dims,
            vmem_limit_bytes=vmem_limit,
        ),
        cost_estimate=cost,
    )(p2, t2)

    # Tiny (<=16 KiB) cross-lane reduction in JAX glue.
    num_sq = jnp.sum(num_part) + tail_num
    den_sq = jnp.sum(den_part) + tail_den
    return num_sq, den_sq


def normalized_error(y_pred, y_true):
    """||y_pred - y_true||_2 / ||y_true||_2, returning 0.0 if denominator is 0."""
    num_sq, den_sq = _sum_squares(y_pred, y_true)
    numerator = jnp.sqrt(num_sq)
    denominator = jnp.sqrt(den_sq)
    # Guard the divide itself so no inf/nan intermediates are produced.
    safe_den = jnp.where(denominator == 0.0, jnp.float32(1.0), denominator)
    return jnp.where(denominator == 0.0, jnp.float32(0.0),
                     numerator / safe_den)


if __name__ == "__main__":
    key = jax.random.PRNGKey(0)
    k1, k2 = jax.random.split(key)

    # main case: NCHW [2, 4, 16, 16] (2048 elements, lane-aligned fast path)
    shape = (2, 4, 16, 16)
    y_pred = jax.random.normal(k1, shape, dtype=jnp.float32)
    y_true = jax.random.normal(k2, shape, dtype=jnp.float32)
    out = normalized_error(y_pred, y_true)
    jax.block_until_ready(out)
    ref = jnp.linalg.norm(y_pred - y_true) / jnp.linalg.norm(y_true)
    assert jnp.allclose(out, ref, rtol=1e-5, atol=1e-6), (out, ref)

    # zero-denominator branch
    zeros = jnp.zeros(shape, dtype=jnp.float32)
    out_zero = normalized_error(y_pred, zeros)
    jax.block_until_ready(out_zero)
    assert out_zero == 0.0

    # ragged case: partial row block (pl.when-gated mask path) + <128-elem tail
    rshape = (2, 5, 131)
    rp = jax.random.normal(k1, rshape, dtype=jnp.float32)
    rt = jax.random.normal(k2, rshape, dtype=jnp.float32)
    rout = normalized_error(rp, rt)
    jax.block_until_ready(rout)
    rref = jnp.linalg.norm(rp - rt) / jnp.linalg.norm(rt)
    assert jnp.allclose(rout, rref, rtol=1e-5, atol=1e-6), (rout, rref)

    # bf16 inputs: exercises cast-on-load + dtype-aware sublane packing
    bshape = (4, 8, 64)
    bp = jax.random.normal(k1, bshape, dtype=jnp.bfloat16)
    bt = jax.random.normal(k2, bshape, dtype=jnp.bfloat16)
    bout = normalized_error(bp, bt)
    jax.block_until_ready(bout)
    bpf = bp.astype(jnp.float32)
    btf = bt.astype(jnp.float32)
    bref = jnp.linalg.norm(bpf - btf) / jnp.linalg.norm(btf)
    assert jnp.allclose(bout, bref, rtol=1e-4, atol=1e-6), (bout, bref)

    # multi-step reduction (small tile override): scratch-accumulator carry
    # across grid steps + pl.when-gated masking of the final partial block
    mshape = (20, 128)
    mp = jax.random.normal(k1, mshape, dtype=jnp.float32)
    mt = jax.random.normal(k2, mshape, dtype=jnp.float32)
    mnum, mden = _sum_squares(mp, mt, max_tile_rows=8)
    jax.block_until_ready((mnum, mden))
    mnum_ref = jnp.sum((mp - mt) ** 2)
    mden_ref = jnp.sum(mt ** 2)
    assert jnp.allclose(mnum, mnum_ref, rtol=1e-5), (mnum, mnum_ref)
    assert jnp.allclose(mden, mden_ref, rtol=1e-5), (mden, mden_ref)

    print("KERNEL_OK")
</pallas_src>

<mosaic_0001>
module attributes {stable_mosaic.version = 11 : i64} {
  func.func @_norm_kernel(%arg0: i32, %arg1: memref<16x128xf32, #tpu.memory_space<vmem>>, %arg2: memref<16x128xf32, #tpu.memory_space<vmem>>, %arg3: memref<8x128xf32, #tpu.memory_space<vmem>>, %arg4: memref<8x128xf32, #tpu.memory_space<vmem>>, %arg5: memref<8x128xf32, #tpu.memory_space<vmem>>, %arg6: memref<8x128xf32, #tpu.memory_space<vmem>>) attributes {dimension_semantics = [#tpu.dimension_semantics<arbitrary>], iteration_bounds = array<i64: 1>, scalar_prefetch = 0 : i64, scratch_operands = 2 : i64, tpu.core_type = #tpu.core_type<tc>, window_params = [{transform_indices = @transform_0, window_bounds = array<i64: 16, 128>}, {transform_indices = @transform_1, window_bounds = array<i64: 16, 128>}, {pipeline_mode = #tpu.pipeline_mode<synchronous>, transform_indices = @transform_2, window_bounds = array<i64: 8, 128>}, {pipeline_mode = #tpu.pipeline_mode<synchronous>, transform_indices = @transform_3, window_bounds = array<i64: 8, 128>}]} {
    %c0_i32 = arith.constant 0 : i32
    %0 = arith.cmpi eq, %arg0, %c0_i32 : i32
    %1 = arith.extui %0 : i1 to i32
    %c0_i32_0 = arith.constant 0 : i32
    %2 = arith.cmpi ne, %1, %c0_i32_0 : i32
    scf.if %2 {
      %cst_15 = arith.constant 0.000000e+00 : f32
      %21 = vector.broadcast %cst_15 : f32 to vector<8x128xf32>
      %c0_16 = arith.constant 0 : index
      %c0_17 = arith.constant 0 : index
      %22 = vector.load %arg5[%c0_16, %c0_17] : memref<8x128xf32, #tpu.memory_space<vmem>>, vector<8x128xf32>
      tpu.vector_store %arg5[%c0_16, %c0_17], %21 {strides = array<i32>} : memref<8x128xf32, #tpu.memory_space<vmem>>, vector<8x128xf32>,
      %cst_18 = arith.constant 0.000000e+00 : f32
      %23 = vector.broadcast %cst_18 : f32 to vector<8x128xf32>
      %c0_19 = arith.constant 0 : index
      %c0_20 = arith.constant 0 : index
      %24 = vector.load %arg6[%c0_19, %c0_20] : memref<8x128xf32, #tpu.memory_space<vmem>>, vector<8x128xf32>
      tpu.vector_store %arg6[%c0_19, %c0_20], %23 {strides = array<i32>} : memref<8x128xf32, #tpu.memory_space<vmem>>, vector<8x128xf32>,
    } else {
    }
    %c0 = arith.constant 0 : index
    %c0_1 = arith.constant 0 : index
    %3 = vector.load %arg1[%c0, %c0_1] : memref<16x128xf32, #tpu.memory_space<vmem>>, vector<16x128xf32>
    %c0_2 = arith.constant 0 : index
    %c0_3 = arith.constant 0 : index
    %4 = vector.load %arg2[%c0_2, %c0_3] : memref<16x128xf32, #tpu.memory_space<vmem>>, vector<16x128xf32>
    %5 = arith.subf %3, %4 : vector<16x128xf32>
    %6 = arith.mulf %5, %5 : vector<16x128xf32>
    %7 = arith.mulf %4, %4 : vector<16x128xf32>
    %c0_4 = arith.constant 0 : index
    %c0_5 = arith.constant 0 : index
    %8 = vector.load %arg5[%c0_4, %c0_5] : memref<8x128xf32, #tpu.memory_space<vmem>>, vector<8x128xf32>
    %9 = vector.shape_cast %6 : vector<16x128xf32> to vector<2x8x128xf32>
    %cst = arith.constant dense<0.000000e+00> : vector<8x128xf32>
    %10 = vector.multi_reduction <add>, %9, %cst [0] : vector<2x8x128xf32> to vector<8x128xf32>
    %11 = arith.addf %8, %10 : vector<8x128xf32>
    %c0_6 = arith.constant 0 : index
    %c0_7 = arith.constant 0 : index
    %12 = vector.load %arg5[%c0_6, %c0_7] : memref<8x128xf32, #tpu.memory_space<vmem>>, vector<8x128xf32>
    tpu.vector_store %arg5[%c0_6, %c0_7], %11 {strides = array<i32>} : memref<8x128xf32, #tpu.memory_space<vmem>>, vector<8x128xf32>,
    %c0_8 = arith.constant 0 : index
    %c0_9 = arith.constant 0 : index
    %13 = vector.load %arg6[%c0_8, %c0_9] : memref<8x128xf32, #tpu.memory_space<vmem>>, vector<8x128xf32>
    %14 = vector.shape_cast %7 : vector<16x128xf32> to vector<2x8x128xf32>
    %cst_10 = arith.constant dense<0.000000e+00> : vector<8x128xf32>
    %15 = vector.multi_reduction <add>, %14, %cst_10 [0] : vector<2x8x128xf32> to vector<8x128xf32>
    %16 = arith.addf %13, %15 : vector<8x128xf32>
    %c0_11 = arith.constant 0 : index
    %c0_12 = arith.constant 0 : index
    %17 = vector.load %arg6[%c0_11, %c0_12] : memref<8x128xf32, #tpu.memory_space<vmem>>, vector<8x128xf32>
    tpu.vector_store %arg6[%c0_11, %c0_12], %16 {strides = array<i32>} : memref<8x128xf32, #tpu.memory_space<vmem>>, vector<8x128xf32>,
    %c0_i32_13 = arith.constant 0 : i32
    %18 = arith.cmpi eq, %arg0, %c0_i32_13 : i32
    %19 = arith.extui %18 : i1 to i32
    %c0_i32_14 = arith.constant 0 : i32
    %20 = arith.cmpi ne, %19, %c0_i32_14 : i32
    scf.if %20 {
      %c0_15 = arith.constant 0 : index
      %c0_16 = arith.constant 0 : index
      %21 = vector.load %arg5[%c0_15, %c0_16] : memref<8x128xf32, #tpu.memory_space<vmem>>, vector<8x128xf32>
      %c0_17 = arith.constant 0 : index
      %c0_18 = arith.constant 0 : index
      %22 = vector.load %arg3[%c0_17, %c0_18] : memref<8x128xf32, #tpu.memory_space<vmem>>, vector<8x128xf32>
      tpu.vector_store %arg3[%c0_17, %c0_18], %21 {strides = array<i32>} : memref<8x128xf32, #tpu.memory_space<vmem>>, vector<8x128xf32>,
      %c0_19 = arith.constant 0 : index
      %c0_20 = arith.constant 0 : index
      %23 = vector.load %arg6[%c0_19, %c0_20] : memref<8x128xf32, #tpu.memory_space<vmem>>, vector<8x128xf32>
      %c0_21 = arith.constant 0 : index
      %c0_22 = arith.constant 0 : index
      %24 = vector.load %arg4[%c0_21, %c0_22] : memref<8x128xf32, #tpu.memory_space<vmem>>, vector<8x128xf32>
      tpu.vector_store %arg4[%c0_21, %c0_22], %23 {strides = array<i32>} : memref<8x128xf32, #tpu.memory_space<vmem>>, vector<8x128xf32>,
    } else {
    }
    return
  }
  func.func @transform_0(%arg0: i32) -> (i32, i32) {
    %c0_i32 = arith.constant 0 : i32
    %c0_i32_0 = arith.constant 0 : i32
    return %arg0, %c0_i32 : i32, i32
  }
  func.func @transform_1(%arg0: i32) -> (i32, i32) {
    %c0_i32 = arith.constant 0 : i32
    %c0_i32_0 = arith.constant 0 : i32
    return %arg0, %c0_i32 : i32, i32
  }
  func.func @transform_2(%arg0: i32) -> (i32, i32) {
    %c0_i32 = arith.constant 0 : i32
    %c0_i32_0 = arith.constant 0 : i32
    %c0_i32_1 = arith.constant 0 : i32
    return %c0_i32, %c0_i32_0 : i32, i32
  }
  func.func @transform_3(%arg0: i32) -> (i32, i32) {
    %c0_i32 = arith.constant 0 : i32
    %c0_i32_0 = arith.constant 0 : i32
    %c0_i32_1 = arith.constant 0 : i32
    return %c0_i32, %c0_i32_0 : i32, i32
  }
}

</mosaic_0001>

<bundles_post_ra>
// kernel: tpu_custom_call.1
= control target key start
LH: loop header
LB: loop body
LE: loop exit
PB: predicated region body
PF: predicated region fallthrough
CT: control target
= control target key end

     0   :  { %9 = vsyncpa [#allocation5], 0  ;;  %s280_s0 = inlined_call_operand.hbm [shape: f32[16,128], index: 0, kind: input, shape index: {}]   ;;  %s281_s1 = inlined_call_operand.hbm [shape: f32[16,128], index: 1, kind: input, shape index: {}]   ;;  %s282_s2 = inlined_call_operand.hbm [shape: f32[8,128], index: 2, kind: output, shape index: {0}]   ;;  %s283_s3 = inlined_call_operand.hbm [shape: f32[8,128], index: 3, kind: output, shape index: {1}]  }
   0x1   :  { %10 = vsyncpa [#allocation8], 0 }
   0x2   :  { %11 = vsyncpa [#allocation6], 0 }
   0x3   :  { %12 = vsyncpa [#allocation11], 0  ;;  %s206_s12 = smov [#allocation4]   ;;  %s110_s16 = scalar_lea.hbm %s280_s0, 256 }
   0x4   :  { %s18_s13 = sshll.u32 %s206_s12, 4  ;;  %p111_p0 = scmp.ne.s32.totalorder %s280_s0, %s110_s16  ;;  %s19_s13 = int_to_ptr.vmem [resolvable:$true] %s18_s13 }
   0x5   :  { %p114_p1 = scmp.lt.u32.totalorder %s110_s16, %s280_s0 }
   0x7   :  { %p116_p2 = pnand %p114_p1, %p111_p0 }
   0x9   :  { %119 = shalt.err (!%p116_p2)
}
   0xa   :  { %s120_s21 = scalar_lea.vmem %s19_s13, 256  ;;  %p125_p4 = scmp.lt.s32.totalorder %s19_s13, %s19_s13 }
   0xb   :  { %p121_p3 = scmp.ne.s32.totalorder %s19_s13, %s120_s21  ;;  %p126_p5 = scmp.lt.s32.totalorder %s120_s21, %s120_s21 }
   0xd   :  { %p127_p6 = por %p126_p5, %p125_p4 }
   0xf   :  { %p128_p7 = pnand %p127_p6, %p121_p3 }
  0x11   :  { %131 = shalt.err (!%p128_p7)
}
  0x12   :  { %s207_s22 = smov 128   ;;  %s208_s23 = smov 8  }
  0x13   :  { %24 = dma.hbm_to_vmem [thread:$0]  %s280_s0, 256, %s19_s13, [#allocation5], %s207_s22, %s207_s22, %s208_s23  }
  0x14   :  { %s209_s26 = smov [#allocation7]   ;;  %s132_s30 = scalar_lea.hbm %s281_s1, 256 }
  0x15   :  { %s30_s27 = sshll.u32 %s209_s26, 4  ;;  %p133_p8 = scmp.ne.s32.totalorder %s281_s1, %s132_s30  ;;  %s31_s27 = int_to_ptr.vmem [resolvable:$true] %s30_s27 }
  0x16   :  { %p136_p9 = scmp.lt.u32.totalorder %s132_s30, %s281_s1 }
  0x18   :  { %p138_p10 = pnand %p136_p9, %p133_p8 }
  0x1a   :  { %141 = shalt.err (!%p138_p10)
}
  0x1b   :  { %s142_s8 = scalar_lea.vmem %s31_s27, 256  ;;  %p147_p12 = scmp.lt.s32.totalorder %s31_s27, %s31_s27 }
  0x1c   :  { %p143_p11 = scmp.ne.s32.totalorder %s31_s27, %s142_s8  ;;  %p148_p13 = scmp.lt.s32.totalorder %s142_s8, %s142_s8 }
  0x1e   :  { %p149_p0 = por %p148_p13, %p147_p12 }
  0x20   :  { %p150_p1 = pnand %p149_p0, %p143_p11 }
  0x22   :  { %153 = shalt.err (!%p150_p1)
}
  0x23   :  { %36 = dma.hbm_to_vmem [thread:$0]  %s281_s1, 256, %s31_s27, [#allocation8], %s207_s22, %s207_s22, %s208_s23  }
  0x24   :  { %198 = dma.done.wait [#allocation5], 256  }
  0x25   :  { %199 = vsyncadd [#allocation5], 4294967040 }
  0x26   :  { %200 = dma.done.wait [#allocation8], 256  }
  0x27   :  { %201 = vsyncadd [#allocation8], 4294967040  ;;  %v49_v0 = vld [vmem:[#allocation4] sm:$0xff]  ;;  %v50_v1 = vld [vmem:[#allocation4 + $0x8] sm:$0xff]  ;;  %s210_s10 = smov [#allocation10]   ;;  %s211_s12 = smov [#allocation9]  }
  0x28   :  { %v51_v2 = vld [vmem:[#allocation7] sm:$0xff]  ;;  %v52_v3 = vld [vmem:[#allocation7 + $0x8] sm:$0xff]  ;;  %s90_s11 = sshll.u32 %s210_s10, 4  ;;  %s80_s13 = sshll.u32 %s211_s12, 4  ;;  %s91_s11 = int_to_ptr.vmem [resolvable:$true] %s90_s11  ;;  %s81_s13 = int_to_ptr.vmem [resolvable:$true] %s80_s13 }
  0x29   :  { %v53_v4 = vsub.f32 %v49_v0, %v51_v2  ;;  %v57_v5 = vmul.f32 %v51_v2, %v51_v2  ;;  %v54_v6 = vsub.f32 %v50_v1, %v52_v3  ;;  %v58_v7 = vmul.f32 %v52_v3, %v52_v3  ;;  %s154_s1 = scalar_lea.vmem %s91_s11, 128  ;;  %p159_p3 = scmp.lt.s32.totalorder %s91_s11, %s91_s11 }
  0x2a   :  { %p155_p2 = scmp.ne.s32.totalorder %s91_s11, %s154_s1  ;;  %p160_p4 = scmp.lt.s32.totalorder %s154_s1, %s154_s1 }
  0x2b   :  { %v55_v8 = vmul.f32 %v53_v4, %v53_v4  ;;  %v56_v9 = vmul.f32 %v54_v6, %v54_v6  ;;  %v64_v10 = vadd.f32 %v58_v7, %v57_v5 }
  0x2c   :  { %p161_p5 = por %p160_p4, %p159_p3 }
  0x2d   :  { %v60_v11 = vadd.f32 %v56_v9, %v55_v8  ;;  %73 = vst [vmem:[#allocation10] sm:$0xff] %v64_v10 }
  0x2e   :  { %p162_p6 = pnand %p161_p5, %p155_p2 }
  0x30   :  { %165 = shalt.err (!%p162_p6)
}
  0x31   :  { %s166_s16 = scalar_lea.hbm %s283_s3, 128 }
  0x32   :  { %p167_p7 = scmp.ne.s32.totalorder %s283_s3, %s166_s16  ;;  %p170_p8 = scmp.lt.u32.totalorder %s166_s16, %s283_s3 }
  0x34   :  { %p172_p9 = pnand %p170_p8, %p167_p7 }
  0x36   :  { %175 = shalt.err (!%p172_p9)
}
  0x37   :  { %93 = dma.vmem_to_hbm [thread:$0]  %s91_s11, 128, %s283_s3, [#allocation11]   ;;  %71 = vst [vmem:[#allocation9] sm:$0xff] %v60_v11 }
  0x38   :  { %s176_s23 = scalar_lea.vmem %s81_s13, 128  ;;  %p181_p11 = scmp.lt.s32.totalorder %s81_s13, %s81_s13 }
  0x39   :  { %p177_p10 = scmp.ne.s32.totalorder %s81_s13, %s176_s23  ;;  %p182_p12 = scmp.lt.s32.totalorder %s176_s23, %s176_s23 }
  0x3b   :  { %p183_p13 = por %p182_p12, %p181_p11 }
  0x3d   :  { %p184_p0 = pnand %p183_p13, %p177_p10 }
  0x3f   :  { %187 = shalt.err (!%p184_p0)
}
  0x40   :  { %s188_s26 = scalar_lea.hbm %s282_s2, 128 }
  0x41   :  { %p189_p1 = scmp.ne.s32.totalorder %s282_s2, %s188_s26  ;;  %p192_p2 = scmp.lt.u32.totalorder %s188_s26, %s282_s2 }
  0x43   :  { %p194_p3 = pnand %p192_p2, %p189_p1 }
  0x45   :  { %197 = shalt.err (!%p194_p3)
}
  0x46   :  { %83 = dma.vmem_to_hbm [thread:$0]  %s81_s13, 128, %s282_s2, [#allocation6]  }
  0x47   :  { %202 = dma.done.wait [#allocation6], 128  }
  0x48   :  { %203 = vsyncadd [#allocation6], 4294967168 }
  0x49   :  { %204 = dma.done.wait [#allocation11], 128  }
  0x4a   :  { %205 = vsyncadd [#allocation11], 4294967168 }
  0x4b   :  { %100 = vsyncpa [#allocation5], 1 }
  0x4c   :  { %101 = vsyncpa [#allocation8], 1 }
  0x4d   :  { %102 = vsyncpa [#allocation6], 1 }
  0x4e   :  { %103 = vsyncpa [#allocation11], 1 }

</bundles_post_ra>
